<compile_context>
chip_gen: v7x
topology: tpu7x:2x2x1
jax: 0.10.0
libtpu: 0.0.40
codegen_flags: <defaults>
</compile_context>

<pallas_src>
import jax
import jax.numpy as jnp
from jax.experimental import pallas as pl
from jax.experimental.pallas import tpu as pltpu


def _my_loss_kernel(decode_ref, d_ref, out_ref, mse_ref, papr_ref):
    # decode_ref / d_ref: (mse_rows, mse_cols)  lane-dense MSE chunk for this step
    # out_ref:            (block_b, N, C)       batch tile of the symbols
    # mse_ref / papr_ref: (1, 1)                per-step partial sums
    diff = decode_ref[...].astype(jnp.float32) - d_ref[...].astype(jnp.float32)
    mse_ref[...] = jnp.sum(diff * diff, keepdims=True)                # (1, 1)

    o = out_ref[...].astype(jnp.float32)                              # (bb, N, C)
    power = jnp.sqrt(jnp.sum(o * o, axis=2))                          # (bb, N)  EUP sqrt
    mx = jnp.max(power, axis=1, keepdims=True)                        # (bb, 1)  XLU reduce
    sum_p = jnp.sum(power, axis=1, keepdims=True)                     # (bb, 1)
    n_sym = jnp.float32(power.shape[1])                               # compile-time const
    # max / mean == max * N / sum  -> one EUP reciprocal, no divide
    ratio = (mx * n_sym) * pl.reciprocal(sum_p, approx=False)         # (bb, 1)
    papr_ref[...] = jnp.sum(ratio, keepdims=True)                     # (1, 1)


def _pick_block_b(batch, bytes_per_batch_row, budget_bytes=16 << 20):
    """Largest divisor of `batch` whose double-buffered input tiles fit the budget."""
    best = 1
    for cand in range(1, batch + 1):
        if batch % cand == 0 and 2 * cand * bytes_per_batch_row <= budget_bytes:
            best = cand
    return best


def _mse_chunk_layout(chunk):
    """Pick (rows, cols) for one per-step MSE chunk so vregs pack densely."""
    if chunk % 128 == 0:
        return chunk // 128, 128
    return 1, chunk


def my_loss(decode, d, out, alpha, block_b=None):
    """Pallas TPU implementation of My_loss.forward(decode, d, out, alpha)."""
    B, N, C = out.shape
    if decode.shape != d.shape:
        raise ValueError("decode and d must have the same shape")
    if decode.shape[0] != B:
        raise ValueError("decode/d and out must share the leading batch dim")

    per_row_bytes = (N * C * out.dtype.itemsize
                     + 2 * (decode.size // B) * decode.dtype.itemsize)
    if block_b is None:
        block_b = _pick_block_b(B, per_row_bytes)
    if B % block_b != 0:
        raise ValueError(f"block_b={block_b} must divide batch size {B}")
    grid = B // block_b

    # Zero-copy reshape: one lane-dense MSE chunk per grid step, packed into
    # (rows, 128) tiles whenever possible for full-vreg VPU work.
    chunk = decode.size // grid
    mse_rows, mse_cols = _mse_chunk_layout(chunk)
    decode2 = decode.reshape(grid * mse_rows, mse_cols)
    d2 = d.reshape(grid * mse_rows, mse_cols)

    # Advisory cost hint for XLA's scheduler around the custom call.
    in_bytes = (2 * decode.size * decode.dtype.itemsize
                + out.size * out.dtype.itemsize)
    cost = pl.CostEstimate(
        flops=3 * decode.size + 3 * out.size + 6 * B * N,
        transcendentals=B * N + B,
        bytes_accessed=in_bytes + 2 * grid * 4,
    )

    mse_parts, papr_parts = pl.pallas_call(
        _my_loss_kernel,
        out_shape=(jax.ShapeDtypeStruct((grid, 1), jnp.float32),
                   jax.ShapeDtypeStruct((grid, 1), jnp.float32)),
        grid_spec=pltpu.PrefetchScalarGridSpec(
            num_scalar_prefetch=0,
            grid=(grid,),
            in_specs=[
                pl.BlockSpec((mse_rows, mse_cols), lambda i: (i, 0)),
                pl.BlockSpec((mse_rows, mse_cols), lambda i: (i, 0)),
                pl.BlockSpec((block_b, N, C), lambda i: (i, 0, 0)),
            ],
            out_specs=[
                pl.BlockSpec((1, 1), lambda i: (i, 0)),
                pl.BlockSpec((1, 1), lambda i: (i, 0)),
            ],
        ),
        compiler_params=pltpu.CompilerParams(
            dimension_semantics=("parallel",),
            vmem_limit_bytes=32 * 1024 * 1024),
        cost_estimate=cost,
    )(decode2, d2, out)

    # Tiny scalar finalize in the wrapper (XLA): divides folded into constants.
    mse = jnp.sum(mse_parts) * jnp.float32(1.0 / decode.size)
    papr = jnp.sum(papr_parts) * jnp.float32(1.0 / B)
    return mse + jnp.float32(alpha) * papr


def my_loss_ref(decode, d, out, alpha):
    """Pure-JAX reference (mirrors the PyTorch module exactly)."""
    decode = decode.astype(jnp.float32)
    d = d.astype(jnp.float32)
    out = out.astype(jnp.float32)
    power1 = jnp.sqrt(jnp.sum(jnp.square(out), axis=2))
    max1 = jnp.max(power1, axis=1)
    mean1 = jnp.mean(power1, axis=1)
    papr1 = jnp.mean(max1 / mean1)
    mse = jnp.mean(jnp.square(decode - d))
    return mse + alpha * papr1


if __name__ == "__main__":
    key = jax.random.PRNGKey(0)
    k1, k2, k3 = jax.random.split(key, 3)

    B, D = 8, 32          # decode / d: (batch, features)
    N, C = 16, 32         # out: (batch, symbols, per-symbol features)

    decode = jax.random.normal(k1, (B, D), dtype=jnp.float32)
    d = jax.random.normal(k2, (B, D), dtype=jnp.float32)
    out = jax.random.normal(k3, (B, N, C), dtype=jnp.float32)
    alpha = 0.1

    ref = my_loss_ref(decode, d, out, alpha)

    # Auto-picked block size (single grid step at these tiny shapes).
    loss_auto = jax.block_until_ready(my_loss(decode, d, out, alpha))
    assert jnp.allclose(loss_auto, ref, rtol=1e-5, atol=1e-5), (loss_auto, ref)

    # Forced multi-step grid to exercise tiling + partial-sum reduction path
    # (also exercises the non-128-aligned MSE-chunk fallback layout).
    loss_tiled = jax.block_until_ready(my_loss(decode, d, out, alpha, block_b=2))
    assert jnp.allclose(loss_tiled, ref, rtol=1e-5, atol=1e-5), (loss_tiled, ref)

    # 128-aligned chunk path with a multi-step grid.
    loss_tiled4 = jax.block_until_ready(my_loss(decode, d, out, alpha, block_b=4))
    assert jnp.allclose(loss_tiled4, ref, rtol=1e-5, atol=1e-5), (loss_tiled4, ref)

    # bf16 ingress path: inputs stay bf16 on the wire, upcast inside the kernel.
    decode_bf16 = decode.astype(jnp.bfloat16)
    d_bf16 = d.astype(jnp.bfloat16)
    out_bf16 = out.astype(jnp.bfloat16)
    loss_bf16 = jax.block_until_ready(
        my_loss(decode_bf16, d_bf16, out_bf16, alpha, block_b=4))
    ref_bf16 = my_loss_ref(decode_bf16, d_bf16, out_bf16, alpha)
    assert jnp.allclose(loss_bf16, ref_bf16, rtol=1e-4, atol=1e-4), (loss_bf16, ref_bf16)

    print("KERNEL_OK")
</pallas_src>

<mosaic_0001>
module attributes {stable_mosaic.version = 11 : i64} {
  func.func @_my_loss_kernel(%arg0: i32, %arg1: memref<2x128xf32, #tpu.memory_space<vmem>>, %arg2: memref<2x128xf32, #tpu.memory_space<vmem>>, %arg3: memref<8x16x32xf32, #tpu.memory_space<vmem>>, %arg4: memref<1x1xf32, #tpu.memory_space<vmem>>, %arg5: memref<1x1xf32, #tpu.memory_space<vmem>>) attributes {dimension_semantics = [#tpu.dimension_semantics<parallel>], iteration_bounds = array<i64: 1>, scalar_prefetch = 0 : i64, scratch_operands = 0 : i64, tpu.core_type = #tpu.core_type<tc>, window_params = [{transform_indices = @transform_0, window_bounds = array<i64: 2, 128>}, {transform_indices = @transform_1, window_bounds = array<i64: 2, 128>}, {transform_indices = @transform_2, window_bounds = array<i64: 8, 16, 32>}, {transform_indices = @transform_3, window_bounds = array<i64: 1, 1>}, {transform_indices = @transform_4, window_bounds = array<i64: 1, 1>}]} {
    %c0 = arith.constant 0 : index
    %c0_0 = arith.constant 0 : index
    %0 = vector.load %arg1[%c0, %c0_0] : memref<2x128xf32, #tpu.memory_space<vmem>>, vector<2x128xf32>
    %c0_1 = arith.constant 0 : index
    %c0_2 = arith.constant 0 : index
    %1 = vector.load %arg2[%c0_1, %c0_2] : memref<2x128xf32, #tpu.memory_space<vmem>>, vector<2x128xf32>
    %2 = arith.subf %0, %1 : vector<2x128xf32>
    %3 = arith.mulf %2, %2 : vector<2x128xf32>
    %4 = vector.shape_cast %3 : vector<2x128xf32> to vector<1x2x128xf32>
    %cst = arith.constant dense<0.000000e+00> : vector<1xf32>
    %5 = vector.multi_reduction <add>, %4, %cst [1, 2] : vector<1x2x128xf32> to vector<1xf32>
    %6 = vector.shape_cast %5 : vector<1xf32> to vector<1x1x1xf32>
    %7 = vector.extract %6[0, 0, 0] : f32 from vector<1x1x1xf32>
    %8 = vector.broadcast %7 : f32 to vector<1x1xf32>
    %c0_3 = arith.constant 0 : index
    %c0_4 = arith.constant 0 : index
    %9 = vector.load %arg4[%c0_3, %c0_4] : memref<1x1xf32, #tpu.memory_space<vmem>>, vector<1x1xf32>
    tpu.vector_store %arg4[%c0_3, %c0_4], %8 {strides = array<i32>} : memref<1x1xf32, #tpu.memory_space<vmem>>, vector<1x1xf32>,
    %c0_5 = arith.constant 0 : index
    %c0_6 = arith.constant 0 : index
    %c0_7 = arith.constant 0 : index
    %10 = vector.load %arg3[%c0_5, %c0_6, %c0_7] : memref<8x16x32xf32, #tpu.memory_space<vmem>>, vector<8x16x32xf32>
    %11 = arith.mulf %10, %10 : vector<8x16x32xf32>
    %cst_8 = arith.constant dense<0.000000e+00> : vector<8x16xf32>
    %12 = vector.multi_reduction <add>, %11, %cst_8 [2] : vector<8x16x32xf32> to vector<8x16xf32>
    %13 = math.sqrt %12 : vector<8x16xf32>
    %cst_9 = arith.constant dense<0xFF800000> : vector<8xf32>
    %14 = vector.multi_reduction <maximumf>, %13, %cst_9 [1] : vector<8x16xf32> to vector<8xf32>
    %15 = vector.shape_cast %14 : vector<8xf32> to vector<8x1xf32>
    %cst_10 = arith.constant dense<0.000000e+00> : vector<8xf32>
    %16 = vector.multi_reduction <add>, %13, %cst_10 [1] : vector<8x16xf32> to vector<8xf32>
    %17 = vector.shape_cast %16 : vector<8xf32> to vector<8x1xf32>
    %cst_11 = arith.constant 1.600000e+01 : f32
    %18 = vector.broadcast %cst_11 : f32 to vector<8x1xf32>
    %19 = arith.mulf %15, %18 : vector<8x1xf32>
    %20 = tpu.reciprocal %17 : vector<8x1xf32> -> vector<8x1xf32>
    %21 = arith.mulf %19, %20 : vector<8x1xf32>
    %22 = vector.shape_cast %21 : vector<8x1xf32> to vector<1x8x1xf32>
    %cst_12 = arith.constant dense<0.000000e+00> : vector<1xf32>
    %23 = vector.multi_reduction <add>, %22, %cst_12 [1, 2] : vector<1x8x1xf32> to vector<1xf32>
    %24 = vector.shape_cast %23 : vector<1xf32> to vector<1x1x1xf32>
    %25 = vector.extract %24[0, 0, 0] : f32 from vector<1x1x1xf32>
    %26 = vector.broadcast %25 : f32 to vector<1x1xf32>
    %c0_13 = arith.constant 0 : index
    %c0_14 = arith.constant 0 : index
    %27 = vector.load %arg5[%c0_13, %c0_14] : memref<1x1xf32, #tpu.memory_space<vmem>>, vector<1x1xf32>
    tpu.vector_store %arg5[%c0_13, %c0_14], %26 {strides = array<i32>} : memref<1x1xf32, #tpu.memory_space<vmem>>, vector<1x1xf32>,
    return
  }
  func.func @transform_0(%arg0: i32) -> (i32, i32) {
    %c0_i32 = arith.constant 0 : i32
    %c0_i32_0 = arith.constant 0 : i32
    return %arg0, %c0_i32 : i32, i32
  }
  func.func @transform_1(%arg0: i32) -> (i32, i32) {
    %c0_i32 = arith.constant 0 : i32
    %c0_i32_0 = arith.constant 0 : i32
    return %arg0, %c0_i32 : i32, i32
  }
  func.func @transform_2(%arg0: i32) -> (i32, i32, i32) {
    %c0_i32 = arith.constant 0 : i32
    %c0_i32_0 = arith.constant 0 : i32
    %c0_i32_1 = arith.constant 0 : i32
    return %arg0, %c0_i32, %c0_i32_0 : i32, i32, i32
  }
  func.func @transform_3(%arg0: i32) -> (i32, i32) {
    %c0_i32 = arith.constant 0 : i32
    %c0_i32_0 = arith.constant 0 : i32
    return %arg0, %c0_i32 : i32, i32
  }
  func.func @transform_4(%arg0: i32) -> (i32, i32) {
    %c0_i32 = arith.constant 0 : i32
    %c0_i32_0 = arith.constant 0 : i32
    return %arg0, %c0_i32 : i32, i32
  }
}

</mosaic_0001>

<bundles_post_ra>
// kernel: tpu_custom_call.1
= control target key start
LH: loop header
LB: loop body
LE: loop exit
PB: predicated region body
PF: predicated region fallthrough
CT: control target
= control target key end

     0   :  { %10 = vsyncpa [#allocation3], 0  ;;  %s891_s0 = inlined_call_operand.hbm [shape: f32[2,128], index: 0, kind: input, shape index: {}]   ;;  %s892_s1 = inlined_call_operand.vmem [shape: f32[2,128], index: 1, kind: input, shape index: {}]   ;;  %s893_s2 = inlined_call_operand.hbm [shape: f32[8,16,32], index: 2, kind: input, shape index: {}]   ;;  %s894_s3 = inlined_call_operand.hbm [shape: f32[1,1], index: 3, kind: output, shape index: {0}]   ;;  %s895_s4 = inlined_call_operand.hbm [shape: f32[1,1], index: 4, kind: output, shape index: {1}]  }
   0x1   :  { %11 = vsyncpa [#allocation6], 0 }
   0x2   :  { %12 = vsyncpa [#allocation4], 0 }
   0x3   :  { %13 = vsyncpa [#allocation9], 0  ;;  %s555_s15 = smov [#allocation2]   ;;  %s556_s17 = smov [#allocation5]  }
   0x4   :  { %s20_s16 = sshll.u32 %s555_s15, 4  ;;  %s31_s18 = sshll.u32 %s556_s17, 4  ;;  %s21_s16 = int_to_ptr.vmem [resolvable:$true] %s20_s16  ;;  %s586_s18 = int_to_ptr.vmem [resolvable:$true] %s31_s18 }
   0x5   :  { %s459_s21 = scalar_lea.hbm %s891_s0, 32 }
   0x6   :  { %p460_p0 = scmp.ne.s32.totalorder %s891_s0, %s459_s21  ;;  %p463_p1 = scmp.lt.u32.totalorder %s459_s21, %s891_s0 }
   0x8   :  { %p465_p2 = pnand %p463_p1, %p460_p0 }
   0xa   :  { %468 = shalt.err (!%p465_p2)
}
   0xb   :  { %s469_s26 = scalar_lea.vmem %s21_s16, 32  ;;  %p474_p4 = scmp.lt.s32.totalorder %s21_s16, %s21_s16 }
   0xc   :  { %p470_p3 = scmp.ne.s32.totalorder %s21_s16, %s469_s26  ;;  %p475_p5 = scmp.lt.s32.totalorder %s469_s26, %s469_s26 }
   0xe   :  { %p476_p6 = por %p475_p5, %p474_p4 }
  0x10   :  { %p477_p7 = pnand %p476_p6, %p470_p3 }
  0x12   :  { %480 = shalt.err (!%p477_p7)
}
  0x13   :  { %23 = dma.hbm_to_vmem [thread:$0]  %s891_s0, 32, %s21_s16, [#allocation3]  }
  0x14   :  { %s481_s5 = scalar_lea.hbm %s893_s2, 2048 }
  0x15   :  { %p482_p8 = scmp.ne.s32.totalorder %s893_s2, %s481_s5  ;;  %p485_p9 = scmp.lt.u32.totalorder %s481_s5, %s893_s2 }
  0x17   :  { %p487_p10 = pnand %p485_p9, %p482_p8 }
  0x19   :  { %490 = shalt.err (!%p487_p10)
}
  0x1a   :  { %s491_s10 = scalar_lea.vmem %s586_s18, 2048  ;;  %p496_p12 = scmp.lt.s32.totalorder %s586_s18, %s586_s18 }
  0x1b   :  { %p492_p11 = scmp.ne.s32.totalorder %s586_s18, %s491_s10  ;;  %p497_p13 = scmp.lt.s32.totalorder %s491_s10, %s491_s10 }
  0x1d   :  { %p498_p0 = por %p497_p13, %p496_p12 }
  0x1f   :  { %p499_p1 = pnand %p498_p0, %p492_p11 }
  0x21   :  { %502 = shalt.err (!%p499_p1)
}
  0x22   :  { %s557_s0 = smov 128   ;;  %s558_s11 = smov 8  }
  0x23   :  { %37 = dma.hbm_to_vmem [thread:$0]  %s893_s2, 2048, %s586_s18, [#allocation6], %s557_s0, %s557_s0, %s558_s11  }
  0x24   :  { %547 = dma.done.wait [#allocation3], 32  }
  0x25   :  { %548 = vsyncadd [#allocation3], 4294967264 }
  0x26   :  { %549 = dma.done.wait [#allocation6], 2048  }
  0x27   :  { %550 = vsyncadd [#allocation6], 4294965248  ;;  %v64_v0 = vld [vmem:[#allocation5 + $0x10] sm:$0xff]  ;;  %vm94_vm0 = vcmask 261120   ;;  %v62_v1 = vld [vmem:[#allocation5] sm:$0xff]  ;;  %v271_v50 = vlaneseq  ;;  %s559_s15 = smov [#allocation7]  }
  0x28   :  { %v65_v2 = vld [vmem:[#allocation5 + $0x18] sm:$0xff]  ;;  %v80_v3 = vmul.f32 %v64_v0, %v64_v0  ;;  %v78_v4 = vmul.f32 %v62_v1, %v62_v1  ;;  %v63_v6 = vld [vmem:[#allocation5 + $0x8] sm:$0xff]  ;;  %v66_v9 = vld [vmem:[#allocation5 + $0x20] sm:$0xff]  ;;  %s391_s16 = sshll.u32 %s559_s15, 4  ;;  %s392_s16 = int_to_ptr.vmem [resolvable:$true] %s391_s16 }
  0x29   :  { %v81_v5 = vmul.f32 %v65_v2, %v65_v2  ;;  %v79_v7 = vmul.f32 %v63_v6, %v63_v6  ;;  %v67_v8 = vld [vmem:[#allocation5 + $0x28] sm:$0xff]  ;;  %v82_v15 = vmul.f32 %v66_v9, %v66_v9  ;;  %v69_v16 = vld [vmem:[#allocation5 + $0x38] sm:$0xff]  ;;  %v68_v17 = vld [vmem:[#allocation5 + $0x30] sm:$0xff]  ;;  %v272_v53 = vand.u32 127, %v271_v50  ;;  %s503_s17 = scalar_lea.vmem %s392_s16, 16  ;;  %s507_s18 = scalar_lea.vmem %s392_s16, 32 }
  0x2a   :  { %v101_v10 = vsel %vm94_vm0, %v80_v3, 0.0  ;;  %v95_v11 = vsel %vm94_vm0, %v78_v4, 0.0  ;;  %v83_v14 = vmul.f32 %v67_v8, %v67_v8  ;;  %v85_v20 = vmul.f32 %v69_v16, %v69_v16  ;;  %v71_v22 = vld [vmem:[#allocation5 + $0x48] sm:$0xff]  ;;  %v70_v23 = vld [vmem:[#allocation5 + $0x40] sm:$0xff]  ;;  %v73_v28 = vld [vmem:[#allocation5 + $0x58] sm:$0xff]  ;;  %p504_p2 = scmp.ne.s32.totalorder %s392_s16, %s503_s17  ;;  %p508_p3 = scmp.lt.s32.totalorder %s392_s16, %s392_s16 }
  0x2b   :  { %102 = vadd.xlane.f32.xlu1 %v101_v10  ;;  %96 = vadd.xlane.f32.xlu0 %v95_v11  ;;  %v104_v12 = vsel %vm94_vm0, %v81_v5, 0.0  ;;  %v98_v13 = vsel %vm94_vm0, %v79_v7, 0.0  ;;  %v107_v19 = vsel %vm94_vm0, %v82_v15, 0.0  ;;  %v84_v21 = vmul.f32 %v68_v17, %v68_v17  ;;  %v72_v29 = vld [vmem:[#allocation5 + $0x50] sm:$0xff]  ;;  %v75_v34 = vld [vmem:[#allocation5 + $0x68] sm:$0xff]  ;;  %v74_v35 = vld [vmem:[#allocation5 + $0x60] sm:$0xff]  ;;  %p509_p4 = scmp.lt.s32.totalorder %s507_s18, %s503_s17 }
  0x2c   :  { %v110_v18 = vsel %vm94_vm0, %v83_v14, 0.0  ;;  %v116_v24 = vsel %vm94_vm0, %v85_v20, 0.0  ;;  %v87_v26 = vmul.f32 %v71_v22, %v71_v22  ;;  %v86_v27 = vmul.f32 %v70_v23, %v70_v23  ;;  %v77_v40 = vld [vmem:[#allocation5 + $0x78] sm:$0xff]  ;;  %v76_v41 = vld [vmem:[#allocation5 + $0x70] sm:$0xff] }
  0x2d   :  { %v113_v25 = vsel %vm94_vm0, %v84_v21, 0.0  ;;  %v89_v32 = vmul.f32 %v73_v28, %v73_v28  ;;  %v88_v33 = vmul.f32 %v72_v29, %v72_v29  ;;  %v91_v38 = vmul.f32 %v75_v34, %v75_v34  ;;  %p510_p5 = por %p509_p4, %p508_p3 }
  0x2e   :  { %v122_v30 = vsel %vm94_vm0, %v87_v26, 0.0  ;;  %v119_v31 = vsel %vm94_vm0, %v86_v27, 0.0  ;;  %v90_v39 = vmul.f32 %v74_v35, %v74_v35  ;;  %v93_v44 = vmul.f32 %v77_v40, %v77_v40 }
  0x2f   :  { %105 = vadd.xlane.f32.xlu1 %v104_v12  ;;  %99 = vadd.xlane.f32.xlu0 %v98_v13  ;;  %v128_v36 = vsel %vm94_vm0, %v89_v32, 0.0  ;;  %v125_v37 = vsel %vm94_vm0, %v88_v33, 0.0  ;;  %v134_v42 = vsel %vm94_vm0, %v91_v38, 0.0  ;;  %v92_v45 = vmul.f32 %v76_v41, %v76_v41  ;;  %p511_p6 = pnand %p510_p5, %p504_p2 }
  0x30   :  { %v131_v43 = vsel %vm94_vm0, %v90_v39, 0.0  ;;  %v140_v46 = vsel %vm94_vm0, %v93_v44, 0.0  ;;  %v274_v54 = vshrl.u32 %v271_v50, 7  ;;  %v277_v55 = vadd.s32 4294967288, %v272_v53 }
  0x31   :  { %v137_v47 = vsel %vm94_vm0, %v92_v45, 0.0 }
  0x32   :  { %v645_v60 = vsub.s32 %v272_v53, %v274_v54  ;;  %v647_v61 = vsub.s32 %v277_v55, %v274_v54 }
  0x33   :  { %111 = vadd.xlane.f32.xlu1 %v110_v18  ;;  %108 = vadd.xlane.f32.xlu0 %v107_v19 }
  0x37   :  { %117 = vadd.xlane.f32.xlu1 %v116_v24  ;;  %114 = vadd.xlane.f32.xlu0 %v113_v25 }
  0x3b   :  { %123 = vadd.xlane.f32.xlu1 %v122_v30  ;;  %120 = vadd.xlane.f32.xlu0 %v119_v31 }
  0x3f   :  { %129 = vadd.xlane.f32.xlu1 %v128_v36  ;;  %126 = vadd.xlane.f32.xlu0 %v125_v37 }
  0x43   :  { %135 = vadd.xlane.f32.xlu1 %v134_v42  ;;  %132 = vadd.xlane.f32.xlu0 %v131_v43 }
  0x47   :  { %141 = vadd.xlane.f32.xlu1 %v140_v46  ;;  %138 = vadd.xlane.f32.xlu0 %v137_v47 }
  0xb8   :  { %v103_v48 = vpop.xlane.xlu1 %102  ;;  %v97_v49 = vpop.xlane.xlu0 %96 }
  0xb9   :  { %425 = vrsqrt.f32 %v103_v48  ;;  %vm159_vm1 = vcmp.eq.f32.partialorder %v103_v48, inf  ;;  %vm161_vm2 = vcmp.eq.f32.partialorder %v103_v48, 0.0  ;;  %v162_v2 = vand.u32 2147483648, %v103_v48 }
  0xba   :  { %427 = vrsqrt.f32 %v97_v49  ;;  %vm145_vm3 = vcmp.eq.f32.partialorder %v97_v49, inf  ;;  %vm147_vm4 = vcmp.eq.f32.partialorder %v97_v49, 0.0  ;;  %v148_v4 = vand.u32 2147483648, %v97_v49 }
  0xbc   :  { %v633_v51 = vpop.xlane.xlu1 %105  ;;  %v635_v52 = vpop.xlane.xlu0 %99 }
  0xbd   :  { %429 = vrsqrt.f32 %v633_v51  ;;  %vm166_vm5 = vcmp.eq.f32.partialorder %v633_v51, inf  ;;  %vm168_vm6 = vcmp.eq.f32.partialorder %v633_v51, 0.0  ;;  %v169_v5 = vand.u32 2147483648, %v633_v51 }
  0xbe   :  { %431 = vrsqrt.f32 %v635_v52  ;;  %vm152_vm7 = vcmp.eq.f32.partialorder %v635_v52, inf  ;;  %vm154_vm8 = vcmp.eq.f32.partialorder %v635_v52, 0.0  ;;  %v155_v8 = vand.u32 2147483648, %v635_v52 }
  0xc0   :  { %v639_v56 = vpop.xlane.xlu1 %111  ;;  %v641_v57 = vpop.xlane.xlu0 %108 }
  0xc1   :  { %433 = vrsqrt.f32 %v639_v56  ;;  %vm180_vm9 = vcmp.eq.f32.partialorder %v639_v56, inf  ;;  %vm182_vm10 = vcmp.eq.f32.partialorder %v639_v56, 0.0  ;;  %v183_v14 = vand.u32 2147483648, %v639_v56 }
  0xc2   :  { %435 = vrsqrt.f32 %v641_v57  ;;  %vm173_vm11 = vcmp.eq.f32.partialorder %v641_v57, inf  ;;  %vm175_vm12 = vcmp.eq.f32.partialorder %v641_v57, 0.0  ;;  %v176_v16 = vand.u32 2147483648, %v641_v57 }
  0xc3   :  { %v426_v58 = vpop.eup %425 }
  0xc4   :  { %v428_v59 = vpop.eup %427  ;;  %v649_v62 = vpop.xlane.xlu1 %117  ;;  %v158_v0 = vmul.f32 %v426_v58, %v103_v48 }
  0xc5   :  { %v651_v63 = vpop.xlane.xlu0 %114  ;;  %v144_v1 = vmul.f32 %v428_v59, %v97_v49  ;;  %437 = vrsqrt.f32 %v649_v62  ;;  %vm194_vm13 = vcmp.eq.f32.partialorder %v649_v62, inf  ;;  %v197_v26 = vand.u32 2147483648, %v649_v62 }
  0xc6   :  { %439 = vrsqrt.f32 %v651_v63  ;;  %v160_v11 = vsel %vm159_vm1, %v103_v48, %v158_v0  ;;  %vm196_vm14 = vcmp.eq.f32.partialorder %v649_v62, 0.0  ;;  %vm187_vm15 = vcmp.eq.f32.partialorder %v651_v63, inf }
  0xc7   :  { %v430_v3 = vpop.eup %429  ;;  %v146_v12 = vsel %vm145_vm3, %v97_v49, %v144_v1  ;;  %v679_v18 = vsel %vm161_vm2, %v162_v2, %v160_v11  ;;  %vm189_vm0 = vcmp.eq.f32.partialorder %v651_v63, 0.0  ;;  %v190_v27 = vand.u32 2147483648, %v651_v63 }
  0xc8   :  { %v432_v6 = vpop.eup %431  ;;  %v165_v7 = vmul.f32 %v430_v3, %v633_v51  ;;  %v662_v9 = vpop.xlane.xlu1 %123  ;;  %v682_v19 = vsel %vm147_vm4, %v148_v4, %v146_v12  ;;  %v287_v29 = vrot.slane %v679_v18, %v645_v60 }
  0xc9   :  { %v664_v10 = vpop.xlane.xlu0 %120  ;;  %v151_v13 = vmul.f32 %v432_v6, %v635_v52  ;;  %441 = vrsqrt.f32 %v662_v9  ;;  %v276_v30 = vrot.slane %v682_v19, %v645_v60  ;;  %vm208_vm1 = vcmp.eq.f32.partialorder %v662_v9, inf }
  0xca   :  { %443 = vrsqrt.f32 %v664_v10  ;;  %v167_v20 = vsel %vm166_vm5, %v633_v51, %v165_v7  ;;  %v211_v36 = vand.u32 2147483648, %v662_v9  ;;  %vm201_vm2 = vcmp.eq.f32.partialorder %v664_v10, inf }
  0xcb   :  { %v434_v15 = vpop.eup %433  ;;  %v153_v24 = vsel %vm152_vm7, %v635_v52, %v151_v13  ;;  %v709_v31 = vsel %vm168_vm6, %v169_v5, %v167_v20  ;;  %vm210_vm3 = vcmp.eq.f32.partialorder %v662_v9, 0.0  ;;  %vm203_vm4 = vcmp.eq.f32.partialorder %v664_v10, 0.0 }
  0xcc   :  { %v436_v17 = vpop.eup %435  ;;  %v179_v21 = vmul.f32 %v434_v15, %v639_v56  ;;  %v688_v22 = vpop.xlane.xlu1 %129  ;;  %v714_v33 = vsel %vm154_vm8, %v155_v8, %v153_v24  ;;  %v291_v41 = vrot.slane %v709_v31, %v647_v61  ;;  %v204_v42 = vand.u32 2147483648, %v664_v10 }
  0xcd   :  { %v690_v23 = vpop.xlane.xlu0 %126  ;;  %v172_v25 = vmul.f32 %v436_v17, %v641_v57  ;;  %445 = vrsqrt.f32 %v688_v22  ;;  %vm282_vm5 = vcmask 130112   ;;  %v281_v44 = vrot.slane %v714_v33, %v647_v61 }
  0xce   :  { %447 = vrsqrt.f32 %v690_v23  ;;  %v181_v34 = vsel %vm180_vm9, %v639_v56, %v179_v21  ;;  %vm222_vm6 = vcmp.eq.f32.partialorder %v688_v22, inf  ;;  %vm224_vm7 = vcmp.eq.f32.partialorder %v688_v22, 0.0 }
  0xcf   :  { %v438_v28 = vpop.eup %437  ;;  %v174_v39 = vsel %vm173_vm11, %v641_v57, %v172_v25  ;;  %v741_v45 = vsel %vm182_vm10, %v183_v14, %v181_v34  ;;  %v225_v54 = vand.u32 2147483648, %v688_v22  ;;  %vm215_vm8 = vcmp.eq.f32.partialorder %v690_v23, inf }
  0xd0   :  { %v440_v32 = vpop.eup %439  ;;  %v193_v35 = vmul.f32 %v438_v28, %v649_v62  ;;  %v721_v37 = vpop.xlane.xlu1 %135  ;;  %v747_v47 = vsel %vm175_vm12, %v176_v16, %v174_v39  ;;  %v300_v55 = vrot.slane %v741_v45, %v647_v61  ;;  %vm217_vm9 = vcmp.eq.f32.partialorder %v690_v23, 0.0 }
  0xd1   :  { %v723_v38 = vpop.xlane.xlu0 %132  ;;  %v186_v40 = vmul.f32 %v440_v32, %v651_v63  ;;  %449 = vrsqrt.f32 %v721_v37  ;;  %v218_v56 = vand.u32 2147483648, %v690_v23  ;;  %v296_v58 = vrot.slane %v747_v47, %v645_v60 }
  0xd2   :  { %451 = vrsqrt.f32 %v723_v38  ;;  %v195_v48 = vsel %vm194_vm13, %v649_v62, %v193_v35  ;;  %vm236_vm10 = vcmp.eq.f32.partialorder %v721_v37, inf  ;;  %vm347_vm11 = vcmask 1041409  }
  0xd3   :  { %v442_v43 = vpop.eup %441  ;;  %v188_v49 = vsel %vm187_vm15, %v651_v63, %v186_v40  ;;  %v198_v59 = vsel %vm196_vm14, %v197_v26, %v195_v48  ;;  %vm238_vm12 = vcmp.eq.f32.partialorder %v721_v37, 0.0  ;;  %vm349_vm13 = vcmask 1042434  }
  0xd4   :  { %v444_v46 = vpop.eup %443  ;;  %v207_v50 = vmul.f32 %v442_v43, %v662_v9  ;;  %v756_v51 = vpop.xlane.xlu1 %141  ;;  %v191_v0 = vsel %vm189_vm0, %v190_v27, %v188_v49  ;;  %v239_v63 = vand.u32 2147483648, %v721_v37  ;;  %vm229_vm14 = vcmp.eq.f32.partialorder %v723_v38, inf }
  0xd5   :  { %v758_v52 = vpop.xlane.xlu0 %138  ;;  %v200_v53 = vmul.f32 %v444_v46, %v664_v10  ;;  %453 = vrsqrt.f32 %v756_v51  ;;  %vm231_vm15 = vcmp.eq.f32.partialorder %v723_v38, 0.0  ;;  %v309_v5 = vrot.slane %v198_v59, %v647_v61 }
  0xd6   :  { %455 = vrsqrt.f32 %v758_v52  ;;  %v209_v2 = vsel %vm208_vm1, %v662_v9, %v207_v50  ;;  %v305_v6 = vrot.slane %v191_v0, %v645_v60  ;;  %v232_v8 = vand.u32 2147483648, %v723_v38 }
  0xd7   :  { %v446_v57 = vpop.eup %445  ;;  %v202_v3 = vsel %vm201_vm2, %v664_v10, %v200_v53  ;;  %vm353_vm1 = vcmask 1044484   ;;  %v212_v12 = vsel %vm210_vm3, %v211_v36, %v209_v2  ;;  %vm250_vm2 = vcmp.eq.f32.partialorder %v756_v51, inf }
  0xd8   :  { %v448_v1 = vpop.eup %447  ;;  %v221_v4 = vmul.f32 %v446_v57, %v688_v22  ;;  %v205_v13 = vsel %vm203_vm4, %v204_v42, %v202_v3  ;;  %vm355_vm0 = vcmask 1045509   ;;  %v253_v17 = vand.u32 2147483648, %v756_v51 }
  0xd9   :  { %v214_v62 = vmul.f32 %v448_v1, %v690_v23  ;;  %vm357_vm3 = vcmask 1046534   ;;  %vm243_vm4 = vcmp.eq.f32.partialorder %v758_v52, inf  ;;  %v246_v21 = vand.u32 2147483648, %v758_v52 }
  0xda   :  { %v223_v7 = vsel %vm222_vm6, %v688_v22, %v221_v4  ;;  %v283_v24 = vsel %vm282_vm5, %v281_v44, %v276_v30  ;;  %v292_v22 = vsel %vm282_vm5, %v291_v41, %v287_v29  ;;  %v314_v25 = vrot.slane %v205_v13, %v645_v60 }
  0xdb   :  { %v450_v11 = vpop.eup %449  ;;  %v216_v14 = vsel %vm215_vm8, %v690_v23, %v214_v62  ;;  %v226_v9 = vsel %vm224_vm7, %v225_v54, %v223_v7  ;;  %v318_v26 = vrot.slane %v212_v12, %v647_v61  ;;  %v301_v33 = vsel %vm282_vm5, %v300_v55, %v296_v58 }
  0xdc   :  { %v452_v15 = vpop.eup %451  ;;  %v235_v16 = vmul.f32 %v450_v11, %v721_v37  ;;  %v219_v20 = vsel %vm217_vm9, %v218_v56, %v216_v14  ;;  %v327_v18 = vrot.slane %v226_v9, %v647_v61  ;;  %vm245_vm6 = vcmp.eq.f32.partialorder %v758_v52, 0.0 }
  0xdd   :  { %v228_v10 = vmul.f32 %v452_v15, %v723_v38  ;;  %v323_v30 = vrot.slane %v219_v20, %v645_v60  ;;  %v310_v36 = vsel %vm282_vm5, %v309_v5, %v305_v6  ;;  %vm252_vm7 = vcmp.eq.f32.partialorder %v756_v51, 0.0 }
  0xde   :  { %v237_v23 = vsel %vm236_vm10, %v721_v37, %v235_v16  ;;  %v348_v40 = vsel %vm347_vm11, %v292_v22, %v283_v24  ;;  %vm896_vm8 = vcmask 1043459   ;;  %vm359_vm9 = vcmask 1047559  }
  0xdf   :  { %v454_v27 = vpop.eup %453  ;;  %v230_v19 = vsel %vm229_vm14, %v723_v38, %v228_v10  ;;  %v240_v28 = vsel %vm238_vm12, %v239_v63, %v237_v23  ;;  %v319_v38 = vsel %vm282_vm5, %v318_v26, %v314_v25  ;;  %v328_v43 = vsel %vm282_vm5, %v327_v18, %v323_v30 }
  0xe0   :  { %v456_v32 = vpop.eup %455  ;;  %v249_v31 = vmul.f32 %v454_v27, %v756_v51  ;;  %v233_v29 = vsel %vm231_vm15, %v232_v8, %v230_v19  ;;  %v336_v34 = vrot.slane %v240_v28, %v647_v61  ;;  %v350_v44 = vsel %vm349_vm13, %v301_v33, %v348_v40 }
  0xe1   :  { %v242_v35 = vmul.f32 %v456_v32, %v758_v52  ;;  %v332_v37 = vrot.slane %v233_v29, %v645_v60  ;;  %v352_v48 = vsel %vm896_vm8, %v310_v36, %v350_v44  ;;  %vm362_vm10 = vcmask 130048  }
  0xe2   :  { %v251_v39 = vsel %vm250_vm2, %v756_v51, %v249_v31  ;;  %v354_v50 = vsel %vm353_vm1, %v319_v38, %v352_v48  ;;  %vm48_vm11 = vcmask 1041408   ;;  %vm60_vm12 = vcmask 0  }
  0xe3   :  { %v244_v41 = vsel %vm243_vm4, %v758_v52, %v242_v35  ;;  %v254_v42 = vsel %vm252_vm7, %v253_v17, %v251_v39  ;;  %v337_v46 = vsel %vm282_vm5, %v336_v34, %v332_v37  ;;  %v356_v51 = vsel %vm355_vm0, %v328_v43, %v354_v50 }
  0xe4   :  { %v247_v45 = vsel %vm245_vm6, %v246_v21, %v244_v41  ;;  %v345_v47 = vrot.slane %v254_v42, %v647_v61  ;;  %v358_v53 = vsel %vm357_vm3, %v337_v46, %v356_v51  ;;  %v44_v61 = vld [vmem:[#allocation2] sm:$0x3] }
  0xe5   :  { %v341_v49 = vrot.slane %v247_v45, %v645_v60  ;;  %v45_v60 = vld [vmem:[%s892_s1] sm:$0x3] }
  0xe6   :  { %v46_v57 = vsub.f32 %v44_v61, %v45_v60 }
  0xe7   :  { %v346_v52 = vsel %vm282_vm5, %v345_v47, %v341_v49  ;;  %vm372_vm5 = vcmask 7168  }
  0xe8   :  { %v360_v54 = vsel %vm359_vm9, %v346_v52, %v358_v53  ;;  %v47_v58 = vmul.f32 %v46_v57, %v46_v57 }
  0xe9   :  { %v366_v55 = vsel %vm362_vm10, %v360_v54, 0.0  ;;  %v363_v56 = vsel %vm362_vm10, %v360_v54, -inf }
  0xea   :  { %367 = vadd.xlane.f32.xlu0 %v366_v55  ;;  %364 = vmax.xlane.f32.xlu1 %v363_v56  ;;  %v49_v59 = vsel %vm48_vm11, %v47_v58, 0.0 }
  0xee   :  { %50 = vadd.xlane.f32.xlu0 %v49_v59 }
 0x177   :  { %v368_v0 = vpop.xlane.xlu0 %367  ;;  %v365_v1 = vpop.xlane.xlu1 %364 }
 0x178   :  { %457 = vrcp.f32 %v368_v0  ;;  %v369_v2 = vmul.f32 16.0, %v365_v1 }
 0x17b   :  { %v51_v63 = vpop.xlane.xlu0 %50 }
 0x17c   :  { %v52_v5 = vrot.slane %v51_v63, 4 }
 0x17e   :  { %v53_v6 = vadd.f32 %v52_v5, %v51_v63 }
 0x180   :  { %v54_v7 = vrot.slane %v53_v6, 2 }
 0x182   :  { %v458_v3 = vpop.eup %457  ;;  %v55_v8 = vadd.f32 %v54_v7, %v53_v6 }
 0x183   :  { %v371_v4 = vmul.f32 %v458_v3, %v369_v2 }
 0x184   :  { %v56_v11 = vrot.slane %v55_v8, 1 }
 0x185   :  { %v373_v62 = vsel %vm372_vm5, %v371_v4, 0.0 }
 0x186   :  { %374 = vadd.xlane.f32.xlu1 %v373_v62  ;;  %v57_v12 = vadd.f32 %v56_v11, %v55_v8 }
 0x188   :  { %415 = vpush %v57_v12 }
 0x1b9   :  { %s416_s1 = spop %415 }
 0x1ba   :  { %v59_v13 = vstv %s416_s1 }
 0x1bb   :  { %61 = vst.msk [vmem:[#allocation7] sm:$0x1] %vm60_vm12, %v59_v13 }
 0x1bc   :  { %514 = shalt.err (!%p511_p6)
}
 0x1bd   :  { %s515_s21 = scalar_lea.hbm %s894_s3, 16 }
 0x1be   :  { %p516_p7 = scmp.ne.s32.totalorder %s894_s3, %s515_s21  ;;  %p519_p8 = scmp.lt.u32.totalorder %s515_s21, %s894_s3 }
 0x1c0   :  { %p521_p9 = pnand %p519_p8, %p516_p7 }
 0x1c2   :  { %524 = shalt.err (!%p521_p9)
}
 0x1c3   :  { %394 = dma.vmem_to_hbm [thread:$0]  %s392_s16, 16, %s894_s3, [#allocation4]  }
 0x1c4   :  { %s560_s28 = smov [#allocation8]  }
 0x1c5   :  { %s401_s29 = sshll.u32 %s560_s28, 4  ;;  %s402_s29 = int_to_ptr.vmem [resolvable:$true] %s401_s29 }
 0x1c6   :  { %s525_s5 = scalar_lea.vmem %s402_s29, 16  ;;  %s529_s6 = scalar_lea.vmem %s402_s29, 32 }
 0x1c7   :  { %p526_p10 = scmp.ne.s32.totalorder %s402_s29, %s525_s5  ;;  %p530_p11 = scmp.lt.s32.totalorder %s402_s29, %s402_s29 }
 0x1c8   :  { %p531_p12 = scmp.lt.s32.totalorder %s529_s6, %s525_s5 }
 0x1ca   :  { %p532_p13 = por %p531_p12, %p530_p11 }
 0x1cc   :  { %p533_p0 = pnand %p532_p13, %p526_p10 }
 0x213   :  { %v375_v14 = vpop.xlane.xlu1 %374 }
 0x214   :  { %v376_v15 = vrot.slane %v375_v14, 4 }
 0x216   :  { %v377_v16 = vadd.f32 %v376_v15, %v375_v14 }
 0x218   :  { %v378_v17 = vrot.slane %v377_v16, 2 }
 0x21a   :  { %v379_v20 = vadd.f32 %v378_v17, %v377_v16 }
 0x21c   :  { %v380_v9 = vrot.slane %v379_v20, 1 }
 0x21e   :  { %v381_v10 = vadd.f32 %v380_v9, %v379_v20 }
 0x220   :  { %417 = vpush %v381_v10 }
 0x251   :  { %s418_s30 = spop %417 }
 0x252   :  { %v383_v21 = vstv %s418_s30 }
 0x253   :  { %384 = vst.msk [vmem:[#allocation8] sm:$0x1] %vm60_vm12, %v383_v21 }
 0x254   :  { %536 = shalt.err (!%p533_p0)
}
 0x255   :  { %s537_s8 = scalar_lea.hbm %s895_s4, 16 }
 0x256   :  { %p538_p1 = scmp.ne.s32.totalorder %s895_s4, %s537_s8  ;;  %p541_p2 = scmp.lt.u32.totalorder %s537_s8, %s895_s4 }
 0x258   :  { %p543_p3 = pnand %p541_p2, %p538_p1 }
 0x25a   :  { %546 = shalt.err (!%p543_p3)
}
 0x25b   :  { %404 = dma.vmem_to_hbm [thread:$0]  %s402_s29, 16, %s895_s4, [#allocation9]  }
 0x25c   :  { %551 = dma.done.wait [#allocation4], 16  }
 0x25d   :  { %552 = vsyncadd [#allocation4], 4294967280 }
 0x25e   :  { %553 = dma.done.wait [#allocation9], 16  }
 0x25f   :  { %554 = vsyncadd [#allocation9], 4294967280 }
 0x260   :  { %411 = vsyncpa [#allocation3], 1 }
 0x261   :  { %412 = vsyncpa [#allocation6], 1 }
 0x262   :  { %413 = vsyncpa [#allocation4], 1 }
 0x263   :  { %414 = vsyncpa [#allocation9], 1 }

</bundles_post_ra>
